<compile_context>
chip_gen: v7x
topology: tpu7x:2x2x1
jax: 0.10.0
libtpu: 0.0.40
codegen_flags: <defaults>
</compile_context>

<pallas_src>
import functools

import jax
import jax.numpy as jnp
from jax import lax
from jax.experimental import pallas as pl
from jax.experimental.pallas import tpu as pltpu


def _round_up(x, m):
    return (x + m - 1) // m * m


def gru_recurrence_kernel(gx_ref, h0_ref, whc_ref, bhn_ref, hall_ref, h_scratch,
                          *, unroll):
    """One grid step == TB time steps of the GRU recurrence for one batch block.

    gx_ref    : (TB, BB, 3Hp) f32   precomputed input projections [r|z|n]
                                    (r/z already include b_ih + b_hh; n has b_in only)
    h0_ref    : (BB, Hp)      f32   initial hidden state for this batch block
    whc_ref   : (Hp, 3Hp)     f32/bf16  [W_hr^T | W_hz^T | W_hn^T] (host-prepped)
    bhn_ref   : (1, Hp)       f32   b_hn (stays inside the r-gated term)
    hall_ref  : (TB, BB, Hp)  f32   hidden states for these TB steps (output)
    h_scratch : VMEM (BB, Hp) f32   hidden state carried across time blocks
    """
    ti = pl.program_id(1)                      # time-block index (serial axis)
    tb, bb, hp = hall_ref.shape

    @pl.when(ti == 0)
    def _():
        h_scratch[...] = h0_ref[...]

    # Weights / bias loaded once per grid step; b_hn broadcast hoisted out of the
    # unrolled time loop (JAX does not CSE broadcast_in_dim).
    whc = whc_ref[...]
    bhn = jnp.broadcast_to(bhn_ref[...], (bb, hp))
    mxu_dtype = whc.dtype

    def step(i, h):
        # Single fused MXU push per timestep: gh = h @ [W_hr^T | W_hz^T | W_hn^T].
        # Only the matmul operands are (optionally) bf16; carry/elementwise stay f32.
        gh = jnp.dot(h.astype(mxu_dtype), whc, preferred_element_type=jnp.float32)
        gx = gx_ref[i]                                          # (BB, 3Hp)
        r = jax.nn.sigmoid(gx[:, :hp] + gh[:, :hp])
        z = jax.nn.sigmoid(gx[:, hp:2 * hp] + gh[:, hp:2 * hp])
        n = jnp.tanh(gx[:, 2 * hp:] + r * (gh[:, 2 * hp:] + bhn))
        h_new = n + z * (h - n)                                 # == (1-z)*n + z*h
        hall_ref[i] = h_new
        return h_new

    h_scratch[...] = lax.fori_loop(0, tb, step, h_scratch[...], unroll=unroll)


def prepare_rnn_params(params, *, mxu_bf16=False):
    """One-time host-side parameter prep (done OUTSIDE the jitted forward):
    pad to lane-dense Hp = round_up(H, 128), fold b_hr/b_hz into the input-projection
    bias, and pre-transpose + concatenate the recurrent weights into (Hp, 3Hp)."""
    wih = params["weight_ih"]        # (3H, C)  [W_ir; W_iz; W_in]
    whh = params["weight_hh"]        # (3H, H)  [W_hr; W_hz; W_hn]
    bih = params["bias_ih"]          # (3H,)
    bhh = params["bias_hh"]          # (3H,)
    H = whh.shape[1]
    C = wih.shape[1]
    Hp = _round_up(H, 128)
    pad_h = lambda v: jnp.pad(v, (0, Hp - H))

    # Per-gate padding of the input-projection weights (gate order r, z, n).
    wih_p = jnp.pad(wih.reshape(3, H, C),
                    ((0, 0), (0, Hp - H), (0, 0))).reshape(3 * Hp, C)

    # b_hr / b_hz sit outside the r-gated term -> fold into the hoisted projection;
    # b_hn stays inside the kernel (multiplied by r).
    bias_x = jnp.concatenate([pad_h(bih[:H] + bhh[:H]),
                              pad_h(bih[H:2 * H] + bhh[H:2 * H]),
                              pad_h(bih[2 * H:])])                        # (3Hp,)

    # Recurrent weights: pad per gate, transpose, concatenate -> (Hp, 3Hp) so the
    # kernel does a single  h @ wh_cat  per timestep with lane-aligned gate slices.
    whh_p = jnp.pad(whh.reshape(3, H, H), ((0, 0), (0, Hp - H), (0, Hp - H)))
    wh_cat = jnp.transpose(whh_p, (2, 0, 1)).reshape(Hp, 3 * Hp)
    if mxu_bf16:
        # v6e/v7x MXU fast path; the kernel keeps the h carry and all elementwise
        # math in f32 and casts only at the matmul input.
        wh_cat = wh_cat.astype(jnp.bfloat16)

    bhn = pad_h(bhh[2 * H:]).reshape(1, Hp)

    return {
        "wih": wih_p,                        # (3Hp, C)
        "bias_x": bias_x,                    # (3Hp,)
        "wh_cat": wh_cat,                    # (Hp, 3Hp)
        "bhn": bhn,                          # (1, Hp)
        "fc_weight": params["fc_weight"],    # (C, H)
        "fc_bias": params["fc_bias"],        # (C,)
    }


@functools.partial(jax.jit, static_argnames=("time_block", "batch_block"))
def rnn_block_forward(decoder_input, decoder_hidden, prep, *, time_block=16,
                      batch_block=8):
    """decoder_input: (B, T, C) f32, decoder_hidden: (1, B, H) f32.

    Returns (fc_out (B, T, C), decoder_hidden_out (1, B, H)) — same as the PyTorch
    module with a single-layer unidirectional GRU (batch_first=True) + Linear.
    """
    B, T, C = decoder_input.shape
    H = prep["fc_weight"].shape[1]
    Hp = prep["wh_cat"].shape[0]
    Bp = _round_up(B, 8)

    TB = min(time_block, T)
    assert T % TB == 0, "sequence length must be a multiple of the time block"
    BB = min(batch_block, Bp)
    assert Bp % BB == 0, "padded batch must be a multiple of the batch block"
    n_tb = T // TB
    n_bb = Bp // BB
    unroll = max(1, min(TB, 8))          # partial unroll, decoupled from TB

    # ---- Hoisted input projection: one matmul, time-major (T, Bp, 3Hp) ------------
    x_p = jnp.pad(decoder_input, ((0, Bp - B), (0, 0), (0, 0)))
    gx = jnp.einsum("btc,gc->tbg", x_p, prep["wih"],
                    preferred_element_type=jnp.float32) + prep["bias_x"]
    h0 = jnp.pad(decoder_hidden[0], ((0, Bp - B), (0, Hp - H)))            # (Bp, Hp)

    # VMEM budget: double-buffered gx / h_all blocks + resident weights + scratch,
    # with 2x headroom; floor above v5e's 16 MiB scoped default, cap within v7x's
    # 64 MiB physical VMEM.
    fp32 = 4
    footprint = fp32 * (2 * TB * BB * 3 * Hp        # gx blocks (double-buffered)
                        + 2 * TB * BB * Hp          # h_all blocks
                        + 2 * Hp * 3 * Hp           # recurrent weights
                        + 2 * BB * Hp + Hp          # h0, b_hn
                        + BB * Hp)                  # h carry scratch
    vmem_limit = int(min(max(2 * footprint, 32 * 1024 * 1024), 64 * 1024 * 1024))

    blk_gx = pl.BlockSpec((TB, BB, 3 * Hp), lambda bi, ti: (ti, bi, 0))
    blk_h = pl.BlockSpec((TB, BB, Hp), lambda bi, ti: (ti, bi, 0))

    h_all = pl.pallas_call(
        functools.partial(gru_recurrence_kernel, unroll=unroll),
        out_shape=jax.ShapeDtypeStruct((T, Bp, Hp), jnp.float32),
        grid_spec=pltpu.PrefetchScalarGridSpec(
            num_scalar_prefetch=0,
            grid=(n_bb, n_tb),                       # (batch blocks, time blocks)
            in_specs=[
                blk_gx,                                              # gx (single array)
                pl.BlockSpec((BB, Hp), lambda bi, ti: (bi, 0)),      # h0
                pl.BlockSpec((Hp, 3 * Hp), lambda bi, ti: (0, 0)),   # W_h_cat
                pl.BlockSpec((1, Hp), lambda bi, ti: (0, 0)),        # b_hn
            ],
            out_specs=blk_h,                                         # h_all
            scratch_shapes=[pltpu.VMEM((BB, Hp), jnp.float32)],
        ),
        compiler_params=pltpu.CompilerParams(
            # batch is embarrassingly parallel (second TC on v7x);
            # time is the serial recurrence and must stay in order.
            dimension_semantics=("parallel", "arbitrary"),
            vmem_limit_bytes=vmem_limit,
        ),
    )(gx, h0, prep["wh_cat"], prep["bhn"])

    # ---- Hoisted FC projection on the un-padded hidden states ---------------------
    h_valid = h_all[:, :B, :H]                                           # (T, B, H)
    fc_out = jnp.einsum("tbh,ch->btc", h_valid, prep["fc_weight"],
                        preferred_element_type=jnp.float32) + prep["fc_bias"]
    return fc_out, h_valid[-1][None]                                     # (1, B, H)


def rnn_block_reference(decoder_input, decoder_hidden, params):
    """Pure-JAX reference (PyTorch GRU semantics, gate order r,z,n) + Linear."""
    B, T, C = decoder_input.shape
    H = decoder_hidden.shape[-1]
    wih, whh = params["weight_ih"], params["weight_hh"]
    bih, bhh = params["bias_ih"], params["bias_hh"]
    wfc, bfc = params["fc_weight"], params["fc_bias"]

    def cell(h, x_t):
        gx = x_t @ wih.T + bih
        gh = h @ whh.T + bhh
        r = jax.nn.sigmoid(gx[:, :H] + gh[:, :H])
        z = jax.nn.sigmoid(gx[:, H:2 * H] + gh[:, H:2 * H])
        n = jnp.tanh(gx[:, 2 * H:] + r * gh[:, 2 * H:])
        h_new = (1.0 - z) * n + z * h
        return h_new, h_new

    x_tm = jnp.transpose(decoder_input, (1, 0, 2))
    h_last, hs = lax.scan(cell, decoder_hidden[0], x_tm)
    y = jnp.einsum("tbh,ch->btc", hs, wfc) + bfc
    return y, h_last[None]


def init_params(key, num_classes, hidden_size):
    """Deterministic init matching PyTorch shapes (uniform(-1/sqrt(H), 1/sqrt(H)))."""
    k = 1.0 / jnp.sqrt(jnp.float32(hidden_size))
    keys = jax.random.split(key, 6)
    u = lambda kk, shape: jax.random.uniform(kk, shape, jnp.float32, -k, k)
    return {
        "weight_ih": u(keys[0], (3 * hidden_size, num_classes)),
        "weight_hh": u(keys[1], (3 * hidden_size, hidden_size)),
        "bias_ih":   u(keys[2], (3 * hidden_size,)),
        "bias_hh":   u(keys[3], (3 * hidden_size,)),
        "fc_weight": u(keys[4], (num_classes, hidden_size)),
        "fc_bias":   u(keys[5], (num_classes,)),
    }


if __name__ == "__main__":
    B, T, NUM_CLASSES, HIDDEN = 2, 8, 4, 32

    root = jax.random.PRNGKey(0)
    k_x, k_h, k_p = jax.random.split(root, 3)

    decoder_input = jax.random.normal(k_x, (B, T, NUM_CLASSES), jnp.float32)
    decoder_hidden = jax.random.normal(k_h, (1, B, HIDDEN), jnp.float32)
    params = init_params(k_p, NUM_CLASSES, HIDDEN)

    ref_y, ref_h = rnn_block_reference(decoder_input, decoder_hidden, params)

    # f32-MXU path; time_block=4 -> 2 time blocks, exercising the cross-block carry.
    prep = prepare_rnn_params(params)
    fc_out, hidden_out = rnn_block_forward(decoder_input, decoder_hidden, prep,
                                           time_block=4)
    jax.block_until_ready((fc_out, hidden_out))
    assert fc_out.shape == (B, T, NUM_CLASSES)
    assert hidden_out.shape == (1, B, HIDDEN)
    assert jnp.allclose(fc_out, ref_y, rtol=5e-3, atol=5e-3)
    assert jnp.allclose(hidden_out, ref_h, rtol=5e-3, atol=5e-3)

    # bf16-MXU path (v6e/v7x fast path: bf16 matmul operands, f32 carry/elementwise).
    prep_bf16 = prepare_rnn_params(params, mxu_bf16=True)
    fc_bf16, hid_bf16 = rnn_block_forward(decoder_input, decoder_hidden, prep_bf16,
                                          time_block=4)
    jax.block_until_ready((fc_bf16, hid_bf16))
    assert jnp.allclose(fc_bf16, ref_y, rtol=5e-2, atol=5e-2)
    assert jnp.allclose(hid_bf16, ref_h, rtol=5e-2, atol=5e-2)

    print("KERNEL_OK")
</pallas_src>

<mosaic_0001>
module attributes {stable_mosaic.version = 11 : i64} {
  func.func @gru_recurrence_kernel(%arg0: i32, %arg1: i32, %arg2: memref<4x8x384xf32, #tpu.memory_space<vmem>>, %arg3: memref<8x128xf32, #tpu.memory_space<vmem>>, %arg4: memref<128x384xf32, #tpu.memory_space<vmem>>, %arg5: memref<1x128xf32, #tpu.memory_space<vmem>>, %arg6: memref<4x8x128xf32, #tpu.memory_space<vmem>>, %arg7: memref<8x128xf32, #tpu.memory_space<vmem>>) attributes {dimension_semantics = [#tpu.dimension_semantics<parallel>, #tpu.dimension_semantics<arbitrary>], iteration_bounds = array<i64: 1, 2>, scalar_prefetch = 0 : i64, scratch_operands = 1 : i64, tpu.core_type = #tpu.core_type<tc>, window_params = [{transform_indices = @transform_0, window_bounds = array<i64: 4, 8, 384>}, {transform_indices = @transform_1, window_bounds = array<i64: 8, 128>}, {pipeline_mode = #tpu.pipeline_mode<synchronous>, transform_indices = @transform_2, window_bounds = array<i64: 128, 384>}, {pipeline_mode = #tpu.pipeline_mode<synchronous>, transform_indices = @transform_3, window_bounds = array<i64: 1, 128>}, {transform_indices = @transform_4, window_bounds = array<i64: 4, 8, 128>}]} {
    %c0_i32 = arith.constant 0 : i32
    %0 = arith.cmpi eq, %arg1, %c0_i32 : i32
    %1 = arith.extui %0 : i1 to i32
    %c0_i32_0 = arith.constant 0 : i32
    %2 = arith.cmpi ne, %1, %c0_i32_0 : i32
    scf.if %2 {
      %c0_36 = arith.constant 0 : index
      %c0_37 = arith.constant 0 : index
      %141 = vector.load %arg3[%c0_36, %c0_37] : memref<8x128xf32, #tpu.memory_space<vmem>>, vector<8x128xf32>
      %c0_38 = arith.constant 0 : index
      %c0_39 = arith.constant 0 : index
      %142 = vector.load %arg7[%c0_38, %c0_39] : memref<8x128xf32, #tpu.memory_space<vmem>>, vector<8x128xf32>
      tpu.vector_store %arg7[%c0_38, %c0_39], %141 {strides = array<i32>} : memref<8x128xf32, #tpu.memory_space<vmem>>, vector<8x128xf32>,
    } else {
    }
    %c0 = arith.constant 0 : index
    %c0_1 = arith.constant 0 : index
    %3 = vector.load %arg4[%c0, %c0_1] : memref<128x384xf32, #tpu.memory_space<vmem>>, vector<128x384xf32>
    %c0_2 = arith.constant 0 : index
    %c0_3 = arith.constant 0 : index
    %4 = vector.load %arg5[%c0_2, %c0_3] : memref<1x128xf32, #tpu.memory_space<vmem>>, vector<1x128xf32>
    %5 = vector.shape_cast %4 : vector<1x128xf32> to vector<1x128xf32>
    %6 = vector.broadcast %5 : vector<1x128xf32> to vector<8x128xf32>
    %c0_4 = arith.constant 0 : index
    %c0_5 = arith.constant 0 : index
    %7 = vector.load %arg7[%c0_4, %c0_5] : memref<8x128xf32, #tpu.memory_space<vmem>>, vector<8x128xf32>
    %c0_i32_6 = arith.constant 0 : i32
    %cst = arith.constant dense<0.000000e+00> : vector<8x384xf32>
    %8 = tpu.matmul %7, %3, %cst {dimension_numbers = #tpu.dot_dimension_numbers<[1], [0], [0], [1], [0, 0, 1, 1], [], []>} : vector<8x128xf32>, vector<128x384xf32>, vector<8x384xf32> -> vector<8x384xf32>
    %9 = arith.index_cast %c0_i32_6 : i32 to index
    %c0_7 = arith.constant 0 : index
    %c0_8 = arith.constant 0 : index
    %10 = vector.load %arg2[%9, %c0_7, %c0_8] : memref<4x8x384xf32, #tpu.memory_space<vmem>>, vector<1x8x384xf32>
    %11 = vector.shape_cast %10 : vector<1x8x384xf32> to vector<8x384xf32>
    %12 = vector.extract_strided_slice %11 {offsets = [0, 0], sizes = [8, 128], strides = [1, 1]} : vector<8x384xf32> to vector<8x128xf32>
    %13 = vector.extract_strided_slice %8 {offsets = [0, 0], sizes = [8, 128], strides = [1, 1]} : vector<8x384xf32> to vector<8x128xf32>
    %14 = arith.addf %12, %13 : vector<8x128xf32>
    %15 = arith.negf %14 : vector<8x128xf32>
    %16 = math.exp %15 : vector<8x128xf32>
    %cst_9 = arith.constant 1.000000e+00 : f32
    %17 = vector.broadcast %cst_9 : f32 to vector<8x128xf32>
    %18 = arith.addf %17, %16 : vector<8x128xf32>
    %19 = arith.divf %17, %18 : vector<8x128xf32>
    %20 = vector.extract_strided_slice %11 {offsets = [0, 128], sizes = [8, 128], strides = [1, 1]} : vector<8x384xf32> to vector<8x128xf32>
    %21 = vector.extract_strided_slice %8 {offsets = [0, 128], sizes = [8, 128], strides = [1, 1]} : vector<8x384xf32> to vector<8x128xf32>
    %22 = arith.addf %20, %21 : vector<8x128xf32>
    %23 = arith.negf %22 : vector<8x128xf32>
    %24 = math.exp %23 : vector<8x128xf32>
    %cst_10 = arith.constant 1.000000e+00 : f32
    %25 = vector.broadcast %cst_10 : f32 to vector<8x128xf32>
    %26 = arith.addf %25, %24 : vector<8x128xf32>
    %27 = arith.divf %25, %26 : vector<8x128xf32>
    %28 = vector.extract_strided_slice %11 {offsets = [0, 256], sizes = [8, 128], strides = [1, 1]} : vector<8x384xf32> to vector<8x128xf32>
    %29 = vector.extract_strided_slice %8 {offsets = [0, 256], sizes = [8, 128], strides = [1, 1]} : vector<8x384xf32> to vector<8x128xf32>
    %30 = arith.addf %29, %6 : vector<8x128xf32>
    %31 = arith.mulf %19, %30 : vector<8x128xf32>
    %32 = arith.addf %28, %31 : vector<8x128xf32>
    %33 = math.tanh %32 : vector<8x128xf32>
    %34 = arith.subf %7, %33 : vector<8x128xf32>
    %35 = arith.mulf %27, %34 : vector<8x128xf32>
    %36 = arith.addf %33, %35 : vector<8x128xf32>
    %37 = arith.index_cast %c0_i32_6 : i32 to index
    %c0_11 = arith.constant 0 : index
    %c0_12 = arith.constant 0 : index
    %38 = vector.load %arg6[%37, %c0_11, %c0_12] : memref<4x8x128xf32, #tpu.memory_space<vmem>>, vector<1x8x128xf32>
    %39 = vector.shape_cast %38 : vector<1x8x128xf32> to vector<8x128xf32>
    %40 = vector.shape_cast %36 : vector<8x128xf32> to vector<1x8x128xf32>
    tpu.vector_store %arg6[%37, %c0_11, %c0_12], %40 {strides = array<i32>} : memref<4x8x128xf32, #tpu.memory_space<vmem>>, vector<1x8x128xf32>,
    %c1_i32 = arith.constant 1 : i32
    %cst_13 = arith.constant dense<0.000000e+00> : vector<8x384xf32>
    %41 = tpu.matmul %36, %3, %cst_13 {dimension_numbers = #tpu.dot_dimension_numbers<[1], [0], [0], [1], [0, 0, 1, 1], [], []>} : vector<8x128xf32>, vector<128x384xf32>, vector<8x384xf32> -> vector<8x384xf32>
    %42 = arith.index_cast %c1_i32 : i32 to index
    %c0_14 = arith.constant 0 : index
    %c0_15 = arith.constant 0 : index
    %43 = vector.load %arg2[%42, %c0_14, %c0_15] : memref<4x8x384xf32, #tpu.memory_space<vmem>>, vector<1x8x384xf32>
    %44 = vector.shape_cast %43 : vector<1x8x384xf32> to vector<8x384xf32>
    %45 = vector.extract_strided_slice %44 {offsets = [0, 0], sizes = [8, 128], strides = [1, 1]} : vector<8x384xf32> to vector<8x128xf32>
    %46 = vector.extract_strided_slice %41 {offsets = [0, 0], sizes = [8, 128], strides = [1, 1]} : vector<8x384xf32> to vector<8x128xf32>
    %47 = arith.addf %45, %46 : vector<8x128xf32>
    %48 = arith.negf %47 : vector<8x128xf32>
    %49 = math.exp %48 : vector<8x128xf32>
    %cst_16 = arith.constant 1.000000e+00 : f32
    %50 = vector.broadcast %cst_16 : f32 to vector<8x128xf32>
    %51 = arith.addf %50, %49 : vector<8x128xf32>
    %52 = arith.divf %50, %51 : vector<8x128xf32>
    %53 = vector.extract_strided_slice %44 {offsets = [0, 128], sizes = [8, 128], strides = [1, 1]} : vector<8x384xf32> to vector<8x128xf32>
    %54 = vector.extract_strided_slice %41 {offsets = [0, 128], sizes = [8, 128], strides = [1, 1]} : vector<8x384xf32> to vector<8x128xf32>
    %55 = arith.addf %53, %54 : vector<8x128xf32>
    %56 = arith.negf %55 : vector<8x128xf32>
    %57 = math.exp %56 : vector<8x128xf32>
    %cst_17 = arith.constant 1.000000e+00 : f32
    %58 = vector.broadcast %cst_17 : f32 to vector<8x128xf32>
    %59 = arith.addf %58, %57 : vector<8x128xf32>
    %60 = arith.divf %58, %59 : vector<8x128xf32>
    %61 = vector.extract_strided_slice %44 {offsets = [0, 256], sizes = [8, 128], strides = [1, 1]} : vector<8x384xf32> to vector<8x128xf32>
    %62 = vector.extract_strided_slice %41 {offsets = [0, 256], sizes = [8, 128], strides = [1, 1]} : vector<8x384xf32> to vector<8x128xf32>
    %63 = arith.addf %62, %6 : vector<8x128xf32>
    %64 = arith.mulf %52, %63 : vector<8x128xf32>
    %65 = arith.addf %61, %64 : vector<8x128xf32>
    %66 = math.tanh %65 : vector<8x128xf32>
    %67 = arith.subf %36, %66 : vector<8x128xf32>
    %68 = arith.mulf %60, %67 : vector<8x128xf32>
    %69 = arith.addf %66, %68 : vector<8x128xf32>
    %70 = arith.index_cast %c1_i32 : i32 to index
    %c0_18 = arith.constant 0 : index
    %c0_19 = arith.constant 0 : index
    %71 = vector.load %arg6[%70, %c0_18, %c0_19] : memref<4x8x128xf32, #tpu.memory_space<vmem>>, vector<1x8x128xf32>
    %72 = vector.shape_cast %71 : vector<1x8x128xf32> to vector<8x128xf32>
    %73 = vector.shape_cast %69 : vector<8x128xf32> to vector<1x8x128xf32>
    tpu.vector_store %arg6[%70, %c0_18, %c0_19], %73 {strides = array<i32>} : memref<4x8x128xf32, #tpu.memory_space<vmem>>, vector<1x8x128xf32>,
    %c2_i32 = arith.constant 2 : i32
    %cst_20 = arith.constant dense<0.000000e+00> : vector<8x384xf32>
    %74 = tpu.matmul %69, %3, %cst_20 {dimension_numbers = #tpu.dot_dimension_numbers<[1], [0], [0], [1], [0, 0, 1, 1], [], []>} : vector<8x128xf32>, vector<128x384xf32>, vector<8x384xf32> -> vector<8x384xf32>
    %75 = arith.index_cast %c2_i32 : i32 to index
    %c0_21 = arith.constant 0 : index
    %c0_22 = arith.constant 0 : index
    %76 = vector.load %arg2[%75, %c0_21, %c0_22] : memref<4x8x384xf32, #tpu.memory_space<vmem>>, vector<1x8x384xf32>
    %77 = vector.shape_cast %76 : vector<1x8x384xf32> to vector<8x384xf32>
    %78 = vector.extract_strided_slice %77 {offsets = [0, 0], sizes = [8, 128], strides = [1, 1]} : vector<8x384xf32> to vector<8x128xf32>
    %79 = vector.extract_strided_slice %74 {offsets = [0, 0], sizes = [8, 128], strides = [1, 1]} : vector<8x384xf32> to vector<8x128xf32>
    %80 = arith.addf %78, %79 : vector<8x128xf32>
    %81 = arith.negf %80 : vector<8x128xf32>
    %82 = math.exp %81 : vector<8x128xf32>
    %cst_23 = arith.constant 1.000000e+00 : f32
    %83 = vector.broadcast %cst_23 : f32 to vector<8x128xf32>
    %84 = arith.addf %83, %82 : vector<8x128xf32>
    %85 = arith.divf %83, %84 : vector<8x128xf32>
    %86 = vector.extract_strided_slice %77 {offsets = [0, 128], sizes = [8, 128], strides = [1, 1]} : vector<8x384xf32> to vector<8x128xf32>
    %87 = vector.extract_strided_slice %74 {offsets = [0, 128], sizes = [8, 128], strides = [1, 1]} : vector<8x384xf32> to vector<8x128xf32>
    %88 = arith.addf %86, %87 : vector<8x128xf32>
    %89 = arith.negf %88 : vector<8x128xf32>
    %90 = math.exp %89 : vector<8x128xf32>
    %cst_24 = arith.constant 1.000000e+00 : f32
    %91 = vector.broadcast %cst_24 : f32 to vector<8x128xf32>
    %92 = arith.addf %91, %90 : vector<8x128xf32>
    %93 = arith.divf %91, %92 : vector<8x128xf32>
    %94 = vector.extract_strided_slice %77 {offsets = [0, 256], sizes = [8, 128], strides = [1, 1]} : vector<8x384xf32> to vector<8x128xf32>
    %95 = vector.extract_strided_slice %74 {offsets = [0, 256], sizes = [8, 128], strides = [1, 1]} : vector<8x384xf32> to vector<8x128xf32>
    %96 = arith.addf %95, %6 : vector<8x128xf32>
    %97 = arith.mulf %85, %96 : vector<8x128xf32>
    %98 = arith.addf %94, %97 : vector<8x128xf32>
    %99 = math.tanh %98 : vector<8x128xf32>
    %100 = arith.subf %69, %99 : vector<8x128xf32>
    %101 = arith.mulf %93, %100 : vector<8x128xf32>
    %102 = arith.addf %99, %101 : vector<8x128xf32>
    %103 = arith.index_cast %c2_i32 : i32 to index
    %c0_25 = arith.constant 0 : index
    %c0_26 = arith.constant 0 : index
    %104 = vector.load %arg6[%103, %c0_25, %c0_26] : memref<4x8x128xf32, #tpu.memory_space<vmem>>, vector<1x8x128xf32>
    %105 = vector.shape_cast %104 : vector<1x8x128xf32> to vector<8x128xf32>
    %106 = vector.shape_cast %102 : vector<8x128xf32> to vector<1x8x128xf32>
    tpu.vector_store %arg6[%103, %c0_25, %c0_26], %106 {strides = array<i32>} : memref<4x8x128xf32, #tpu.memory_space<vmem>>, vector<1x8x128xf32>,
    %c3_i32 = arith.constant 3 : i32
    %cst_27 = arith.constant dense<0.000000e+00> : vector<8x384xf32>
    %107 = tpu.matmul %102, %3, %cst_27 {dimension_numbers = #tpu.dot_dimension_numbers<[1], [0], [0], [1], [0, 0, 1, 1], [], []>} : vector<8x128xf32>, vector<128x384xf32>, vector<8x384xf32> -> vector<8x384xf32>
    %108 = arith.index_cast %c3_i32 : i32 to index
    %c0_28 = arith.constant 0 : index
    %c0_29 = arith.constant 0 : index
    %109 = vector.load %arg2[%108, %c0_28, %c0_29] : memref<4x8x384xf32, #tpu.memory_space<vmem>>, vector<1x8x384xf32>
    %110 = vector.shape_cast %109 : vector<1x8x384xf32> to vector<8x384xf32>
    %111 = vector.extract_strided_slice %110 {offsets = [0, 0], sizes = [8, 128], strides = [1, 1]} : vector<8x384xf32> to vector<8x128xf32>
    %112 = vector.extract_strided_slice %107 {offsets = [0, 0], sizes = [8, 128], strides = [1, 1]} : vector<8x384xf32> to vector<8x128xf32>
    %113 = arith.addf %111, %112 : vector<8x128xf32>
    %114 = arith.negf %113 : vector<8x128xf32>
    %115 = math.exp %114 : vector<8x128xf32>
    %cst_30 = arith.constant 1.000000e+00 : f32
    %116 = vector.broadcast %cst_30 : f32 to vector<8x128xf32>
    %117 = arith.addf %116, %115 : vector<8x128xf32>
    %118 = arith.divf %116, %117 : vector<8x128xf32>
    %119 = vector.extract_strided_slice %110 {offsets = [0, 128], sizes = [8, 128], strides = [1, 1]} : vector<8x384xf32> to vector<8x128xf32>
    %120 = vector.extract_strided_slice %107 {offsets = [0, 128], sizes = [8, 128], strides = [1, 1]} : vector<8x384xf32> to vector<8x128xf32>
    %121 = arith.addf %119, %120 : vector<8x128xf32>
    %122 = arith.negf %121 : vector<8x128xf32>
    %123 = math.exp %122 : vector<8x128xf32>
    %cst_31 = arith.constant 1.000000e+00 : f32
    %124 = vector.broadcast %cst_31 : f32 to vector<8x128xf32>
    %125 = arith.addf %124, %123 : vector<8x128xf32>
    %126 = arith.divf %124, %125 : vector<8x128xf32>
    %127 = vector.extract_strided_slice %110 {offsets = [0, 256], sizes = [8, 128], strides = [1, 1]} : vector<8x384xf32> to vector<8x128xf32>
    %128 = vector.extract_strided_slice %107 {offsets = [0, 256], sizes = [8, 128], strides = [1, 1]} : vector<8x384xf32> to vector<8x128xf32>
    %129 = arith.addf %128, %6 : vector<8x128xf32>
    %130 = arith.mulf %118, %129 : vector<8x128xf32>
    %131 = arith.addf %127, %130 : vector<8x128xf32>
    %132 = math.tanh %131 : vector<8x128xf32>
    %133 = arith.subf %102, %132 : vector<8x128xf32>
    %134 = arith.mulf %126, %133 : vector<8x128xf32>
    %135 = arith.addf %132, %134 : vector<8x128xf32>
    %136 = arith.index_cast %c3_i32 : i32 to index
    %c0_32 = arith.constant 0 : index
    %c0_33 = arith.constant 0 : index
    %137 = vector.load %arg6[%136, %c0_32, %c0_33] : memref<4x8x128xf32, #tpu.memory_space<vmem>>, vector<1x8x128xf32>
    %138 = vector.shape_cast %137 : vector<1x8x128xf32> to vector<8x128xf32>
    %139 = vector.shape_cast %135 : vector<8x128xf32> to vector<1x8x128xf32>
    tpu.vector_store %arg6[%136, %c0_32, %c0_33], %139 {strides = array<i32>} : memref<4x8x128xf32, #tpu.memory_space<vmem>>, vector<1x8x128xf32>,
    %c4_i32 = arith.constant 4 : i32
    %c0_34 = arith.constant 0 : index
    %c0_35 = arith.constant 0 : index
    %140 = vector.load %arg7[%c0_34, %c0_35] : memref<8x128xf32, #tpu.memory_space<vmem>>, vector<8x128xf32>
    tpu.vector_store %arg7[%c0_34, %c0_35], %135 {strides = array<i32>} : memref<8x128xf32, #tpu.memory_space<vmem>>, vector<8x128xf32>,
    return
  }
  func.func @transform_0(%arg0: i32, %arg1: i32) -> (i32, i32, i32) {
    %c0_i32 = arith.constant 0 : i32
    %c0_i32_0 = arith.constant 0 : i32
    return %arg1, %arg0, %c0_i32 : i32, i32, i32
  }
  func.func @transform_1(%arg0: i32, %arg1: i32) -> (i32, i32) {
    %c0_i32 = arith.constant 0 : i32
    %c0_i32_0 = arith.constant 0 : i32
    return %arg0, %c0_i32 : i32, i32
  }
  func.func @transform_2(%arg0: i32, %arg1: i32) -> (i32, i32) {
    %c0_i32 = arith.constant 0 : i32
    %c0_i32_0 = arith.constant 0 : i32
    %c0_i32_1 = arith.constant 0 : i32
    return %c0_i32, %c0_i32_0 : i32, i32
  }
  func.func @transform_3(%arg0: i32, %arg1: i32) -> (i32, i32) {
    %c0_i32 = arith.constant 0 : i32
    %c0_i32_0 = arith.constant 0 : i32
    %c0_i32_1 = arith.constant 0 : i32
    return %c0_i32, %c0_i32_0 : i32, i32
  }
  func.func @transform_4(%arg0: i32, %arg1: i32) -> (i32, i32, i32) {
    %c0_i32 = arith.constant 0 : i32
    %c0_i32_0 = arith.constant 0 : i32
    return %arg1, %arg0, %c0_i32 : i32, i32, i32
  }
}

</mosaic_0001>

<bundles_post_ra>
// kernel: rnn_block_forward.1
= control target key start
LH: loop header
LB: loop body
LE: loop exit
PB: predicated region body
PF: predicated region fallthrough
CT: control target
= control target key end

     0   :  { %9 = vsyncpa [#allocation4], 0  ;;  %s1750_s15 = smov 0   ;;  %s1752_s16 = smov 0   ;;  %s2063_s0 = inlined_call_operand.vmem [shape: f32[8,8,384], index: 0, kind: input, shape index: {}]   ;;  %s2064_s1 = inlined_call_operand.vmem [shape: f32[8,128], index: 1, kind: input, shape index: {}]   ;;  %s2065_s2 = inlined_call_operand.hbm [shape: f32[128,384], index: 2, kind: input, shape index: {}]   ;;  %s2066_s3 = inlined_call_operand.vmem [shape: f32[1,128], index: 3, kind: input, shape index: {}]   ;;  %s2067_s4 = inlined_call_operand.vmem [shape: f32[8,8,128], index: 4, kind: output, shape index: {}]  }
   0x1   :  { %s1754_s17 = smov 0  }
   0x2 LB: > { %s1114_s18 = sadd.s32 4294967295, %s1717_s17   ;;  %s24_s19 = sadd.s32 1, %s1713_s16  ;;  %s1717_s17 = sphi %s1754_s17, %s15_s17   ;;  %s1713_s16 = sphi %s1752_s16, %s2077_s16   ;;  %s1709_s15 = sphi %s1750_s15, %s2076_s15  }
   0x3   : > { %p25_p0 = scmp.ge.s32.totalorder %s24_s19, 2  ;;  %p1116_p1 = scmp.ge.s32.totalorder %s1717_s17, 1 }
   0x4   : > { %p156_p2 = scmp.lt.s32.totalorder %s1717_s17, 3  ;;  %p1775_p4 = scmp.eq.s32.totalorder %s1114_s18, 0 }
   0x5   : > { %s2079_s19 = smov (%p25_p0, %s24_s19), 0  ;;  %s1719_s22 = smov [#allocation3]  }
   0x6   : > { %p1771_p3 = pnand %p1116_p1, %p156_p2  ;;  %s175_s23 = sshll.u32 %s1719_s22, 4  ;;  %s176_s23 = int_to_ptr.vmem [resolvable:$true] %s175_s23 }
   0x7   : > { %s2072_s21 = scalar_select %p1775_p4, 1, 0 }
   0x8   : > { %s2071_s20 = scalar_select %p1771_p3, 1, 0 }
   0x9   : > { %p1587_p5 = pneg %p1771_p3  ;;  %s1663_s27 = scalar_lea.hbm %s2065_s2, 6144 }
   0xa   : > { %p1664_p7 = scmp.ne.s32.totalorder %s2065_s2, %s1663_s27  ;;  %p1670_p11 = scmp.lt.u32.totalorder %s1663_s27, %s2065_s2 }
   0xb   : > { %p1783_p6 = pnand %p1775_p4, %p1587_p5 }
   0xd   : > { %p1665_p8 = pneg %p1783_p6 }
   0xf   : > { %p1666_p9 = pnand %p1665_p8, %p1664_p7 }
  0x11   : > { %p1667_p10 = pneg %p1666_p9 }
  0x13   : > { %p1672_p12 = pnand %p1670_p11, %p1667_p10 }
  0x15   : > { %1675 = shalt.err (!%p1672_p12)
}
  0x16   : > { %s1676_s6 = scalar_lea.vmem %s176_s23, 6144  ;;  %p1684_p2 = scmp.lt.s32.totalorder %s176_s23, %s176_s23 }
  0x17   : > { %p1677_p13 = scmp.ne.s32.totalorder %s176_s23, %s1676_s6  ;;  %p1685_p5 = scmp.lt.s32.totalorder %s1676_s6, %s1676_s6 }
  0x19   : > { %p1679_p0 = pnand %p1677_p13, %p1665_p8  ;;  %p1686_p4 = por %p1685_p5, %p1684_p2 }
  0x1b   : > { %p1680_p1 = pneg %p1679_p0 }
  0x1d   : > { %p1687_p3 = pnand %p1686_p4, %p1680_p1 }
  0x1f   : > { %1690 = shalt.err (!%p1687_p3)
}
  0x20   : > { %s1720_s7 = smov 384   ;;  %s1721_s8 = smov 24  }
  0x21   : > { %1590 = dma.hbm_to_vmem [thread:$0]  (!%p1783_p6), %s2065_s2, 6144, %s176_s23, [#allocation4], %s1720_s7, %s1720_s7, %s1721_s8  }
  0x22   : > { %p2074_p7 = scmp.ne.s32.totalorder %s2071_s20, 0 }
  0x23   : > { %p2075_p9 = scmp.ne.s32.totalorder (!%p2074_p7), %s2072_s21, 0 }
  0x24   : > { %208 = sbr.rel (%p2074_p7) target bundleno = 1133 (0x46d), region = 36 }
  0x2b   : > { %1704 = dma.done.wait (%p2075_p9), [#allocation4], 6144  }
  0x2c   : > { %1706 = vsyncadd (%p2075_p9), [#allocation4], 4294961152  ;;  %s1122_s11 = sshll.u32 %s1709_s15, 2  ;;  %p1126_p4 = scmp.ne.s32.totalorder %s1709_s15, 0 }
  0x2d   : > { %p247_p3 = scmp.lt.s32.totalorder %s1122_s11, 7  ;;  %v274_v0 = vld [vmem:[%s2064_s1] sm:$0xff] (!%p1126_p4) }
  0x2e   : > { %273 = sbr.rel (%p1126_p4) target bundleno = 53 (0x35), region = 44  ;;  %275 = vst [vmem:[#allocation2] sm:$0xff] (!%p1126_p4), %v274_v0 }
  0x2f   : > { %s2081_s11 = smov (!%p247_p3, %s1122_s11), 7 }
  0x30   : > { %s1582_s12 = smul.u32 24, %s2081_s11  ;;  %s1125_s13 = sshll.u32 %s2081_s11, 3 }
  0x31   : > { %s1813_s22 = scalar_lea.vmem %s2067_s4, %s1125_s13 }
  0x32   : > { %s1818_s24 = scalar_lea.vmem %s2063_s0, %s1582_s12 }
  0x35 PF: > { %v277_v1 = vld [vmem:[#allocation3 + $0x8] sm:$0xff]  ;;  %v280_v2 = vld [vmem:[#allocation3 + $0x20] sm:$0xff]  ;;  %v279_v5 = vld [vmem:[#allocation3 + $0x18] sm:$0xff]  ;;  %v1722_v8 = vmov 0.0|0.0   ;;  %v1723_v9 = vmov 0.0   ;;  %vm1724_vm0 = vmmov 0  }
  0x36   : > { %v276_v3 = vld [vmem:[#allocation3] sm:$0xff]  ;;  %v1824_v4 = vpack.c.bf16 %v280_v2, %v277_v1  ;;  %v283_v6 = vld [vmem:[#allocation3 + $0x38] sm:$0xff]  ;;  %v286_v7 = vld [vmem:[#allocation3 + $0x50] sm:$0xff]  ;;  %1390 = vmatprep.subr.bf16.mxu1 %v1722_v8  ;;  %396 = vmatprep.mubr.f32.mxu0 %v1723_v9 }
  0x37   : > { %v1828_v10 = vpack.c.bf16 %v279_v5, %v276_v3  ;;  %v1830_v11 = vpack.c.bf16 %v286_v7, %v283_v6  ;;  %v282_v12 = vld [vmem:[#allocation3 + $0x30] sm:$0xff]  ;;  %v285_v13 = vld [vmem:[#allocation3 + $0x48] sm:$0xff]  ;;  %1250 = vmatprep.mubr.msk.f32.mxu1 %vm1724_vm0, %v1723_v9  ;;  %v292_v15 = vld [vmem:[#allocation3 + $0x80] sm:$0xff] }
  0x38   : > { %v289_v14 = vld [vmem:[#allocation3 + $0x68] sm:$0xff]  ;;  %1359 = vmatprep.subr.bf16.mxu0 %v1824_v4  ;;  %v1836_v16 = vpack.c.bf16 %v285_v13, %v282_v12  ;;  %v288_v18 = vld [vmem:[#allocation3 + $0x60] sm:$0xff]  ;;  %v291_v19 = vld [vmem:[#allocation3 + $0x78] sm:$0xff] }
  0x39   : > { %1361 = vmatpush1.bf16.msra.mxu0 %v1828_v10  ;;  %v1839_v17 = vpack.c.bf16 %v292_v15, %v289_v14  ;;  %v295_v20 = vld [vmem:[#allocation3 + $0x98] sm:$0xff]  ;;  %v298_v21 = vld [vmem:[#allocation3 + $0xb0] sm:$0xff]  ;;  %v1842_v22 = vpack.c.bf16 %v291_v19, %v288_v18  ;;  %v297_v25 = vld [vmem:[#allocation3 + $0xa8] sm:$0xff] }
  0x3a   : > { %1363 = vmatprep.subr.bf16.mxu0 %v1830_v11  ;;  %v294_v23 = vld [vmem:[#allocation3 + $0x90] sm:$0xff]  ;;  %v1845_v24 = vpack.c.bf16 %v298_v21, %v295_v20  ;;  %v281_v27 = vld [vmem:[#allocation3 + $0x28] sm:$0xff]  ;;  %v304_v29 = vld [vmem:[#allocation3 + $0xe0] sm:$0xff] }
  0x3b   : > { %v278_v26 = vld [vmem:[#allocation3 + $0x10] sm:$0xff]  ;;  %v301_v28 = vld [vmem:[#allocation3 + $0xc8] sm:$0xff]  ;;  %v284_v31 = vld [vmem:[#allocation3 + $0x40] sm:$0xff]  ;;  %v1850_v33 = vpack.c.bf16 %v297_v25, %v294_v23 }
  0x3c   : > { %v1847_v30 = vpack.c.bf16 %v281_v27, %v278_v26  ;;  %v287_v32 = vld [vmem:[#allocation3 + $0x58] sm:$0xff]  ;;  %v300_v34 = vld [vmem:[#allocation3 + $0xc0] sm:$0xff]  ;;  %v1856_v36 = vpack.c.bf16 %v304_v29, %v301_v28  ;;  %v290_v38 = vld [vmem:[#allocation3 + $0x70] sm:$0xff] }
  0x3d   : > { %1365 = vmatpush1.bf16.msra.mxu0 %v1836_v16  ;;  %v1853_v35 = vpack.c.bf16 %v287_v32, %v284_v31  ;;  %v303_v37 = vld [vmem:[#allocation3 + $0xd8] sm:$0xff]  ;;  %v293_v39 = vld [vmem:[#allocation3 + $0x88] sm:$0xff]  ;;  %v310_v41 = vld [vmem:[#allocation3 + $0x110] sm:$0xff] }
  0x3e   : > { %1367 = vmatprep.subr.bf16.mxu0 %v1839_v17  ;;  %1392 = vmatpush3.bf16.msra.mxu1 %v1847_v30  ;;  %v307_v40 = vld [vmem:[#allocation3 + $0xf8] sm:$0xff]  ;;  %v1860_v42 = vpack.c.bf16 %v303_v37, %v300_v34  ;;  %v306_v43 = vld [vmem:[#allocation3 + $0xf0] sm:$0xff]  ;;  %v1863_v44 = vpack.c.bf16 %v293_v39, %v290_v38  ;;  %v309_v46 = vld [vmem:[#allocation3 + $0x108] sm:$0xff] }
  0x3f   : > { %1393 = vmatprep.subr.bf16.mxu1 %v1722_v8  ;;  %v1866_v45 = vpack.c.bf16 %v310_v41, %v307_v40  ;;  %v296_v47 = vld [vmem:[#allocation3 + $0xa0] sm:$0xff]  ;;  %v299_v48 = vld [vmem:[#allocation3 + $0xb8] sm:$0xff]  ;;  %v313_v49 = vld [vmem:[#allocation3 + $0x128] sm:$0xff]  ;;  %v1870_v51 = vpack.c.bf16 %v309_v46, %v306_v43 }
  0x40   : > { %v316_v50 = vld [vmem:[#allocation3 + $0x140] sm:$0xff]  ;;  %v1873_v53 = vpack.c.bf16 %v299_v48, %v296_v47  ;;  %v315_v55 = vld [vmem:[#allocation3 + $0x138] sm:$0xff]  ;;  %v302_v56 = vld [vmem:[#allocation3 + $0xd0] sm:$0xff] }
  0x41   : > { %1369 = vmatpush1.bf16.msra.mxu0 %v1842_v22  ;;  %v312_v52 = vld [vmem:[#allocation3 + $0x120] sm:$0xff]  ;;  %v1876_v54 = vpack.c.bf16 %v316_v50, %v313_v49  ;;  %v305_v57 = vld [vmem:[#allocation3 + $0xe8] sm:$0xff]  ;;  %v319_v58 = vld [vmem:[#allocation3 + $0x158] sm:$0xff] }
  0x42   : > { %1371 = vmatprep.subr.bf16.mxu0 %v1845_v24  ;;  %1395 = vmatpush3.bf16.msra.mxu1 %v1853_v35  ;;  %v322_v59 = vld [vmem:[#allocation3 + $0x170] sm:$0xff]  ;;  %v1880_v60 = vpack.c.bf16 %v315_v55, %v312_v52  ;;  %v1883_v62 = vpack.c.bf16 %v305_v57, %v302_v56  ;;  %v321_v0 = vld [vmem:[#allocation3 + $0x168] sm:$0xff]  ;;  %v308_v1 = vld [vmem:[#allocation3 + $0x100] sm:$0xff] }
  0x43   : > { %1396 = vmatprep.subr.bf16.mxu1 %v1722_v8  ;;  %v318_v61 = vld [vmem:[#allocation3 + $0x150] sm:$0xff]  ;;  %v1886_v63 = vpack.c.bf16 %v322_v59, %v319_v58  ;;  %v311_v2 = vld [vmem:[#allocation3 + $0x118] sm:$0xff]  ;;  %v317_v7 = vld [vmem:[#allocation3 + $0x148] sm:$0xff] }
  0x44   : > { %v1890_v3 = vpack.c.bf16 %v321_v0, %v318_v61  ;;  %v1893_v5 = vpack.c.bf16 %v311_v2, %v308_v1  ;;  %v314_v6 = vld [vmem:[#allocation3 + $0x130] sm:$0xff]  ;;  %v1898_v12 = vld [vmem:[#allocation2] sm:$0xff]  ;;  %v320_v14 = vld [vmem:[#allocation3 + $0x160] sm:$0xff] }
  0x45   : > { %1373 = vmatpush1.bf16.msra.mxu0 %v1850_v33  ;;  %v1901_v13 = vpack.c.bf16 %v317_v7, %v314_v6  ;;  %v323_v15 = vld [vmem:[#allocation3 + $0x178] sm:$0xff]  ;;  %v474_v26 = vld [vmem:[%s1818_s24 + $0x8] sm:$0xff]  ;;  %v475_v41 = vld [vmem:[%s1818_s24 + $0x10] sm:$0xff] }
  0x46   : > { %1375 = vmatprep.subr.bf16.mxu0 %v1856_v36  ;;  %1398 = vmatpush3.bf16.msra.mxu1 %v1863_v44  ;;  %v1907_v18 = vpack.c.bf16 %v323_v15, %v320_v14  ;;  %v473_v19 = vld [vmem:[%s1818_s24] sm:$0xff]  ;;  %v1130_v56 = vld [vmem:[%s1818_s24 + $0x18] sm:$0xff] }
  0x47   : > { %1399 = vmatprep.subr.bf16.mxu1 %v1722_v8  ;;  %v1953_v37 = vld [vmem:[%s2066_s3] ss:$0 sm:$0xff] }
  0x48   : > { %v1131_v2 = vld [vmem:[%s1818_s24 + $0x20] sm:$0xff] }
  0x49   : > { %1377 = vmatpush1.bf16.msra.mxu0 %v1860_v42 }
  0x4a   : > { %1379 = vmatprep.subr.bf16.mxu0 %v1866_v45  ;;  %1401 = vmatpush3.bf16.msra.mxu1 %v1873_v53 }
  0x4b   : > { %1402 = vmatprep.subr.bf16.mxu1 %v1722_v8 }
  0x4d   : > { %1381 = vmatpush1.bf16.msra.mxu0 %v1870_v51 }
  0x4e   : > { %1383 = vmatprep.subr.bf16.mxu0 %v1876_v54  ;;  %1404 = vmatpush3.bf16.msra.mxu1 %v1883_v62 }
  0x4f   : > { %1405 = vmatprep.subr.bf16.mxu1 %v1722_v8 }
  0x51   : > { %1385 = vmatpush1.bf16.msra.mxu0 %v1880_v60 }
  0x52   : > { %1387 = vmatprep.subr.bf16.mxu0 %v1886_v63  ;;  %1407 = vmatpush3.bf16.msra.mxu1 %v1893_v5 }
  0x53   : > { %1408 = vmatprep.subr.bf16.mxu1 %v1722_v8 }
  0x55   : > { %1389 = vmatpush1.bf16.msra.mxu0 %v1890_v3 }
  0x56   : > { %1415 = vmatprep.subr.bf16.mxu0 %v1824_v4  ;;  %1410 = vmatpush3.bf16.msra.mxu1 %v1901_v13 }
  0x57   : > { %1411 = vmatprep.subr.bf16.mxu1 %v1722_v8 }
  0x58   : > { %397 = vmatmul.mubr.f32.vlgmr.msra.gmra.mrb[0].mxu0 %v1898_v12 }
  0x59   : > { %1417 = vmatpush1.bf16.msra.mxu0 %v1828_v10  ;;  %562 = vmatprep.mubr.f32.mxu0 %v1723_v9 }
  0x5a   : > { %1419 = vmatprep.subr.bf16.mxu0 %v1830_v11  ;;  %1413 = vmatpush3.bf16.msra.mxu1 %v1907_v18 }
  0x5b   : > { %1446 = vmatprep.subr.bf16.mxu1 %v1722_v8 }
  0x5d   : > { %1421 = vmatpush1.bf16.msra.mxu0 %v1836_v16  ;;  %1251 = vmatmul.mubr.f32.vlgmr.msra.gmra.mrb[0].mxu1 %v1898_v12 }
  0x5e   : > { %1423 = vmatprep.subr.bf16.mxu0 %v1839_v17  ;;  %1448 = vmatpush3.bf16.msra.mxu1 %v1847_v30 }
  0x5f   : > { %1449 = vmatprep.subr.bf16.mxu1 %v1722_v8  ;;  %1285 = vmatprep.mubr.msk.f32.mxu1 %vm1724_vm0, %v1723_v9 }
  0x61   : > { %1425 = vmatpush1.bf16.msra.mxu0 %v1842_v22 }
  0x62   : > { %1427 = vmatprep.subr.bf16.mxu0 %v1845_v24  ;;  %1451 = vmatpush3.bf16.msra.mxu1 %v1853_v35 }
  0x63   : > { %1452 = vmatprep.subr.bf16.mxu1 %v1722_v8 }
  0x65   : > { %1429 = vmatpush1.bf16.msra.mxu0 %v1850_v33 }
  0x66   : > { %1431 = vmatprep.subr.bf16.mxu0 %v1856_v36  ;;  %1454 = vmatpush3.bf16.msra.mxu1 %v1863_v44 }
  0x67   : > { %1455 = vmatprep.subr.bf16.mxu1 %v1722_v8 }
  0x69   : > { %1433 = vmatpush1.bf16.msra.mxu0 %v1860_v42 }
  0x6a   : > { %1435 = vmatprep.subr.bf16.mxu0 %v1866_v45  ;;  %1457 = vmatpush3.bf16.msra.mxu1 %v1873_v53 }
  0x6b   : > { %1458 = vmatprep.subr.bf16.mxu1 %v1722_v8 }
  0x6d   : > { %1437 = vmatpush1.bf16.msra.mxu0 %v1870_v51 }
  0x6e   : > { %1439 = vmatprep.subr.bf16.mxu0 %v1876_v54  ;;  %1460 = vmatpush3.bf16.msra.mxu1 %v1883_v62 }
  0x6f   : > { %1461 = vmatprep.subr.bf16.mxu1 %v1722_v8 }
  0x71   : > { %1441 = vmatpush1.bf16.msra.mxu0 %v1880_v60 }
  0x72   : > { %1443 = vmatprep.subr.bf16.mxu0 %v1886_v63  ;;  %1463 = vmatpush3.bf16.msra.mxu1 %v1893_v5 }
  0x73   : > { %1464 = vmatprep.subr.bf16.mxu1 %v1722_v8 }
  0x75   : > { %1445 = vmatpush1.bf16.msra.mxu0 %v1890_v3 }
  0x76   : > { %1471 = vmatprep.subr.bf16.mxu0 %v1824_v4  ;;  %1466 = vmatpush3.bf16.msra.mxu1 %v1901_v13 }
  0x77   : > { %1467 = vmatprep.subr.bf16.mxu1 %v1722_v8 }
  0x7a   : > { %1469 = vmatpush3.bf16.msra.mxu1 %v1907_v18 }
  0x7b   : > { %1502 = vmatprep.subr.bf16.mxu1 %v1722_v8 }
 0x12b   : > { %v398_v20 = vpop.f32.mrb[0].mxu0 }
 0x12c   : > { %v476_v21 = vadd.f32 %v473_v19, %v398_v20  ;;  %v400_v23 = vpop.f32.mrb[1].mxu0  ;;  %v1132_v20 = vld [vmem:[%s1818_s24 + $0x28] sm:$0xff] }
 0x12d   : > { %v483_v28 = vadd.f32 %v474_v26, %v400_v23 }
 0x12e   : > { %v1128_v25 = vmul.f32 -1.442695, %v476_v21 }
 0x12f   : > { %v1129_v31 = vmul.f32 -1.442695, %v483_v28 }
 0x130   : > { %1623 = vpow2.f32 %v1128_v25  ;;  %v469_v27 = vpop.f32.mrb[0].mxu1 }
 0x131   : > { %v1252_v29 = vpop.f32.mrb[1].mxu1  ;;  %1625 = vpow2.f32 %v1129_v31  ;;  %v490_v38 = vadd.f32 %v1953_v37, %v469_v27 }
 0x13a   : > { %v1624_v32 = vpop.eup %1623 }
 0x13b   : > { %v480_v34 = vadd.f32 1.0, %v1624_v32  ;;  %v1626_v39 = vpop.eup %1625 }
 0x13c   : > { %v487_v46 = vadd.f32 1.0, %v1626_v39 }
 0x13d   : > { %1627 = vrcp.f32 %v480_v34 }
 0x147   : > { %v1628_v40 = vpop.eup %1627 }
 0x148   : > { %v491_v43 = vmul.f32 %v1628_v40, %v490_v38 }
 0x14a   : > { %v492_v47 = vadd.f32 %v491_v43, %v475_v41  ;;  %v1143_v43 = vld [vmem:[%s1818_s24 + $0x50] sm:$0xff] }
 0x14c   : > { %1629 = vtanh.f32 %v492_v47 }
 0x14d   : > { %1631 = vrcp.f32 %v487_v46 }
 0x156   : > { %v1630_v48 = vpop.eup %1629 }
 0x157   : > { %v494_v49 = vsub.f32 %v1898_v12, %v1630_v48  ;;  %v1632_v50 = vpop.eup %1631 }
 0x159   : > { %v495_v52 = vmul.f32 %v1632_v50, %v494_v49 }
 0x15b   : > { %v1958_v55 = vadd.f32 %v1630_v48, %v495_v52 }
 0x15d   : > { %497 = vst [vmem:[%s1813_s22] sm:$0xff] %v1958_v55  ;;  %563 = vmatmul.mubr.f32.vlgmr.msra.gmra.mrb[2].mxu0 %v1958_v55  ;;  %1286 = vmatmul.mubr.f32.vlgmr.msra.gmra.mrb[2].mxu1 %v1958_v55 }
 0x15e   : > { %1473 = vmatpush1.bf16.msra.mxu0 %v1828_v10  ;;  %1504 = vmatpush3.bf16.msra.mxu1 %v1847_v30 }
 0x15f   : > { %1475 = vmatprep.subr.bf16.mxu0 %v1830_v11  ;;  %1505 = vmatprep.subr.bf16.mxu1 %v1722_v8 }
 0x160   : > { %730 = vmatprep.mubr.f32.mxu0 %v1723_v9  ;;  %1320 = vmatprep.mubr.msk.f32.mxu1 %vm1724_vm0, %v1723_v9 }
 0x162   : > { %1477 = vmatpush1.bf16.msra.mxu0 %v1836_v16  ;;  %1507 = vmatpush3.bf16.msra.mxu1 %v1853_v35 }
 0x163   : > { %1479 = vmatprep.subr.bf16.mxu0 %v1839_v17  ;;  %1508 = vmatprep.subr.bf16.mxu1 %v1722_v8 }
 0x166   : > { %1481 = vmatpush1.bf16.msra.mxu0 %v1842_v22  ;;  %1510 = vmatpush3.bf16.msra.mxu1 %v1863_v44 }
 0x167   : > { %1483 = vmatprep.subr.bf16.mxu0 %v1845_v24  ;;  %1511 = vmatprep.subr.bf16.mxu1 %v1722_v8 }
 0x16a   : > { %1485 = vmatpush1.bf16.msra.mxu0 %v1850_v33  ;;  %1513 = vmatpush3.bf16.msra.mxu1 %v1873_v53 }
 0x16b   : > { %1487 = vmatprep.subr.bf16.mxu0 %v1856_v36  ;;  %1514 = vmatprep.subr.bf16.mxu1 %v1722_v8 }
 0x16e   : > { %1489 = vmatpush1.bf16.msra.mxu0 %v1860_v42  ;;  %1516 = vmatpush3.bf16.msra.mxu1 %v1883_v62 }
 0x16f   : > { %1491 = vmatprep.subr.bf16.mxu0 %v1866_v45  ;;  %1517 = vmatprep.subr.bf16.mxu1 %v1722_v8 }
 0x172   : > { %1493 = vmatpush1.bf16.msra.mxu0 %v1870_v51  ;;  %1519 = vmatpush3.bf16.msra.mxu1 %v1893_v5 }
 0x173   : > { %1495 = vmatprep.subr.bf16.mxu0 %v1876_v54  ;;  %1520 = vmatprep.subr.bf16.mxu1 %v1722_v8 }
 0x176   : > { %1497 = vmatpush1.bf16.msra.mxu0 %v1880_v60  ;;  %1522 = vmatpush3.bf16.msra.mxu1 %v1901_v13 }
 0x177   : > { %1499 = vmatprep.subr.bf16.mxu0 %v1886_v63  ;;  %1523 = vmatprep.subr.bf16.mxu1 %v1722_v8 }
 0x17a   : > { %1501 = vmatpush1.bf16.msra.mxu0 %v1890_v3  ;;  %1525 = vmatpush3.bf16.msra.mxu1 %v1907_v18 }
 0x17b   : > { %1527 = vmatprep.subr.bf16.mxu0 %v1824_v4  ;;  %1558 = vmatprep.subr.bf16.mxu1 %v1722_v8 }
 0x230   : > { %v564_v57 = vpop.f32.mrb[2].mxu0  ;;  %v635_v58 = vpop.f32.mrb[2].mxu1 }
 0x231   : > { %v643_v59 = vadd.f32 %v1130_v56, %v564_v57  ;;  %v566_v61 = vpop.f32.mrb[3].mxu0  ;;  %v1287_v0 = vpop.f32.mrb[3].mxu1  ;;  %v657_v15 = vadd.f32 %v1953_v37, %v635_v58  ;;  %v1144_v56 = vld [vmem:[%s1818_s24 + $0x58] sm:$0xff] }
 0x232   : > { %v650_v6 = vadd.f32 %v1131_v2, %v566_v61 }
 0x233   : > { %v1133_v1 = vmul.f32 -1.442695, %v643_v59 }
 0x234   : > { %v1134_v7 = vmul.f32 -1.442695, %v650_v6 }
 0x235   : > { %1633 = vpow2.f32 %v1133_v1 }
 0x236   : > { %1635 = vpow2.f32 %v1134_v7 }
 0x23f   : > { %v1634_v12 = vpop.eup %1633 }
 0x240   : > { %v647_v14 = vadd.f32 1.0, %v1634_v12  ;;  %v1636_v4 = vpop.eup %1635 }
 0x241   : > { %v654_v25 = vadd.f32 1.0, %v1636_v4 }
 0x242   : > { %1637 = vrcp.f32 %v647_v14 }
 0x24c   : > { %v1638_v19 = vpop.eup %1637 }
 0x24d   : > { %v658_v21 = vmul.f32 %v1638_v19, %v657_v15 }
 0x24f   : > { %v659_v23 = vadd.f32 %v1132_v20, %v658_v21 }
 0x251   : > { %1639 = vtanh.f32 %v659_v23 }
 0x252   : > { %1641 = vrcp.f32 %v654_v25 }
 0x25b   : > { %v1640_v26 = vpop.eup %1639 }
 0x25c   : > { %v661_v27 = vsub.f32 %v1958_v55, %v1640_v26  ;;  %v1642_v28 = vpop.eup %1641 }
 0x25e   : > { %v662_v29 = vmul.f32 %v1642_v28, %v661_v27 }
 0x260   : > { %v2004_v31 = vadd.f32 %v1640_v26, %v662_v29 }
 0x262   : > { %1135 = vst [vmem:[%s1813_s22 + $0x8] sm:$0xff] %v2004_v31  ;;  %731 = vmatmul.mubr.f32.vlgmr.msra.gmra.mrb[4].mxu0 %v2004_v31  ;;  %1321 = vmatmul.mubr.f32.vlgmr.msra.gmra.mrb[4].mxu1 %v2004_v31 }
 0x263   : > { %1529 = vmatpush1.bf16.msra.mxu0 %v1828_v10  ;;  %1560 = vmatpush3.bf16.msra.mxu1 %v1847_v30  ;;  %v1137_v30 = vld [vmem:[%s1818_s24 + $0x38] sm:$0xff] }
 0x264   : > { %1531 = vmatprep.subr.bf16.mxu0 %v1830_v11  ;;  %1561 = vmatprep.subr.bf16.mxu1 %v1722_v8 }
 0x265   : > { %898 = vmatprep.mubr.f32.mxu0 %v1723_v9  ;;  %1355 = vmatprep.mubr.msk.f32.mxu1 %vm1724_vm0, %v1723_v9  ;;  %v1136_v9 = vld [vmem:[%s1818_s24 + $0x30] sm:$0xff] }
 0x267   : > { %1533 = vmatpush1.bf16.msra.mxu0 %v1836_v16  ;;  %1563 = vmatpush3.bf16.msra.mxu1 %v1853_v35 }
 0x268   : > { %1535 = vmatprep.subr.bf16.mxu0 %v1839_v17  ;;  %1564 = vmatprep.subr.bf16.mxu1 %v1722_v8 }
 0x26b   : > { %1537 = vmatpush1.bf16.msra.mxu0 %v1842_v22  ;;  %1566 = vmatpush3.bf16.msra.mxu1 %v1863_v44 }
 0x26c   : > { %1539 = vmatprep.subr.bf16.mxu0 %v1845_v24  ;;  %1567 = vmatprep.subr.bf16.mxu1 %v1722_v8 }
 0x26f   : > { %1541 = vmatpush1.bf16.msra.mxu0 %v1850_v33  ;;  %1569 = vmatpush3.bf16.msra.mxu1 %v1873_v53 }
 0x270   : > { %1543 = vmatprep.subr.bf16.mxu0 %v1856_v36  ;;  %1570 = vmatprep.subr.bf16.mxu1 %v1722_v8 }
 0x273   : > { %1545 = vmatpush1.bf16.msra.mxu0 %v1860_v42  ;;  %1572 = vmatpush3.bf16.msra.mxu1 %v1883_v62 }
 0x274   : > { %1547 = vmatprep.subr.bf16.mxu0 %v1866_v45  ;;  %1573 = vmatprep.subr.bf16.mxu1 %v1722_v8 }
 0x277   : > { %1549 = vmatpush1.bf16.msra.mxu0 %v1870_v51  ;;  %1575 = vmatpush3.bf16.msra.mxu1 %v1893_v5  ;;  %v1138_v51 = vld [vmem:[%s1818_s24 + $0x40] sm:$0xff] }
 0x278   : > { %1551 = vmatprep.subr.bf16.mxu0 %v1876_v54  ;;  %1576 = vmatprep.subr.bf16.mxu1 %v1722_v8 }
 0x27b   : > { %1553 = vmatpush1.bf16.msra.mxu0 %v1880_v60  ;;  %1578 = vmatpush3.bf16.msra.mxu1 %v1901_v13 }
 0x27c   : > { %1555 = vmatprep.subr.bf16.mxu0 %v1886_v63  ;;  %1579 = vmatprep.subr.bf16.mxu1 %v1722_v8 }
 0x27f   : > { %1557 = vmatpush1.bf16.msra.mxu0 %v1890_v3  ;;  %1581 = vmatpush3.bf16.msra.mxu1 %v1907_v18  ;;  %v1142_v18 = vld [vmem:[%s1818_s24 + $0x48] sm:$0xff] }
 0x335   : > { %v732_v10 = vpop.f32.mrb[4].mxu0  ;;  %v803_v11 = vpop.f32.mrb[4].mxu1 }
 0x336   : > { %v811_v16 = vadd.f32 %v1136_v9, %v732_v10  ;;  %v734_v17 = vpop.f32.mrb[5].mxu0  ;;  %v1322_v22 = vpop.f32.mrb[5].mxu1  ;;  %v825_v44 = vadd.f32 %v1953_v37, %v803_v11 }
 0x337   : > { %v818_v33 = vadd.f32 %v1137_v30, %v734_v17 }
 0x338   : > { %v1139_v24 = vmul.f32 -1.442695, %v811_v16 }
 0x339   : > { %v1140_v35 = vmul.f32 -1.442695, %v818_v33 }
 0x33a   : > { %1643 = vpow2.f32 %v1139_v24 }
 0x33b   : > { %1645 = vpow2.f32 %v1140_v35 }
 0x344   : > { %v1644_v36 = vpop.eup %1643 }
 0x345   : > { %v815_v42 = vadd.f32 1.0, %v1644_v36  ;;  %v1646_v8 = vpop.eup %1645 }
 0x346   : > { %v822_v60 = vadd.f32 1.0, %v1646_v8 }
 0x347   : > { %1647 = vrcp.f32 %v815_v42 }
 0x351   : > { %v1648_v45 = vpop.eup %1647 }
 0x352   : > { %v826_v53 = vmul.f32 %v1648_v45, %v825_v44 }
 0x354   : > { %v827_v54 = vadd.f32 %v1138_v51, %v826_v53 }
 0x356   : > { %1649 = vtanh.f32 %v827_v54 }
 0x357   : > { %1651 = vrcp.f32 %v822_v60 }
 0x360   : > { %v1650_v62 = vpop.eup %1649 }
 0x361   : > { %v829_v63 = vsub.f32 %v2004_v31, %v1650_v62  ;;  %v1652_v3 = vpop.eup %1651 }
 0x363   : > { %v830_v5 = vmul.f32 %v1652_v3, %v829_v63 }
 0x365   : > { %v831_v13 = vadd.f32 %v1650_v62, %v830_v5 }
 0x367   : > { %1141 = vst [vmem:[%s1813_s22 + $0x10] sm:$0xff] %v831_v13  ;;  %899 = vmatmul.mubr.f32.vlgmr.msra.gmra.mrb[6].mxu0 %v831_v13  ;;  %1356 = vmatmul.mubr.f32.vlgmr.msra.gmra.mrb[6].mxu1 %v831_v13 }
 0x43a   : > { %v900_v32 = vpop.f32.mrb[6].mxu0  ;;  %v971_v34 = vpop.f32.mrb[6].mxu1 }
 0x43b   : > { %v979_v38 = vadd.f32 %v1142_v18, %v900_v32  ;;  %v902_v39 = vpop.f32.mrb[7].mxu0  ;;  %v1357_v40 = vpop.f32.mrb[7].mxu1  ;;  %v993_v52 = vadd.f32 %v1953_v37, %v971_v34 }
 0x43c   : > { %v986_v46 = vadd.f32 %v1143_v43, %v902_v39 }
 0x43d   : > { %v1145_v41 = vmul.f32 -1.442695, %v979_v38 }
 0x43e   : > { %v1146_v47 = vmul.f32 -1.442695, %v986_v46 }
 0x43f   : > { %1653 = vpow2.f32 %v1145_v41 }
 0x440   : > { %1655 = vpow2.f32 %v1146_v47 }
 0x449   : > { %v1654_v48 = vpop.eup %1653 }
 0x44a   : > { %v983_v49 = vadd.f32 1.0, %v1654_v48  ;;  %v1656_v50 = vpop.eup %1655 }
 0x44b   : > { %v990_v59 = vadd.f32 1.0, %v1656_v50 }
 0x44c   : > { %1657 = vrcp.f32 %v983_v49 }
 0x456   : > { %v1658_v55 = vpop.eup %1657 }
 0x457   : > { %v994_v57 = vmul.f32 %v1658_v55, %v993_v52 }
 0x459   : > { %v995_v58 = vadd.f32 %v1144_v56, %v994_v57 }
 0x45b   : > { %1659 = vtanh.f32 %v995_v58 }
 0x45c   : > { %1661 = vrcp.f32 %v990_v59 }
 0x465   : > { %v1660_v61 = vpop.eup %1659 }
 0x466   : > { %v997_v0 = vsub.f32 %v831_v13, %v1660_v61  ;;  %v1662_v1 = vpop.eup %1661 }
 0x468   : > { %v998_v2 = vmul.f32 %v1662_v1, %v997_v0 }
 0x46a   : > { %v999_v6 = vadd.f32 %v1660_v61, %v998_v2 }
 0x46c   : > { %1147 = vst [vmem:[%s1813_s22 + $0x18] sm:$0xff] %v999_v6  ;;  %1002 = vst [vmem:[#allocation2] sm:$0xff] %v999_v6 }
 0x46d PF: > { %s15_s17 = sadd.s32 1, %s1717_s17   ;;  %s2076_s15 = smov %s1713_s16 }
 0x46e   : > { %p12_p6 = scmp.ge.s32.totalorder %s15_s17, 4   ;;  %s2077_s16 = smov %s2079_s19 }
 0x470   :  { %14 = sbr.rel (!%p12_p6) target bundleno = 2 (0x2), region = 84 }
 0x477   :  { %1031 = vsyncpa [#allocation4], 1 }
 0x478   :  { %1033 = vsyncpa [#allocation4 + $0x1], 1 }

</bundles_post_ra>
